<compile_context>
chip_gen: v7x
topology: tpu7x:2x2x1
jax: 0.10.0
libtpu: 0.0.40
codegen_flags: <defaults>
</compile_context>

<pallas_src>
import functools
import math

import jax
import jax.numpy as jnp
from jax.experimental import pallas as pl
from jax.experimental.pallas import tpu as pltpu


# ----------------------------- Pallas kernel --------------------------------

def _lora_conv_kernel(x_ref, w_ref, o_ref, *, k, W):
    """Direct conv over one image with fused im2col.

    x_ref: (1, in_c, H*W)      bf16  -- one image, spatial flattened
    w_ref: (k*k, out_c, in_c)  bf16  -- VMEM-resident conv weight (per-tap)
    o_ref: (1, out_c, L_out)   f32   -- lane-dense flattened output
    """
    out_c = o_ref.shape[1]
    L_out = o_ref.shape[2]

    acc = jnp.zeros((out_c, L_out), jnp.float32)
    # Static, unrolled: k*k shifted MXU dots accumulated in f32.
    for kh in range(k):
        for kw in range(k):
            off = kh * W + kw
            xs = x_ref[0, :, off:off + L_out]          # (in_c, L_out) bf16
            wk = w_ref[kh * k + kw]                    # (out_c, in_c) bf16
            acc = acc + jnp.dot(wk, xs, preferred_element_type=jnp.float32)
    o_ref[0, :, :] = acc.astype(o_ref.dtype)


# ------------------------------- wrapper -------------------------------------

def lora_conv2d(x, A, B, *, kernel_size, scaling):
    """x: (N, in_c, H, W) f32 NCHW -> (N, out_c, OH, OW) f32 NCHW."""
    N, C, H, W = x.shape
    k = kernel_size
    out_c = B.shape[0] // k
    OH, OW = H - k + 1, W - k + 1
    # Flattened-output trick: output position p = oh*W + ow reads input
    # indices p + kh*W + kw; limiting p < OH*W - (k-1) keeps every read
    # in-bounds, and the (k-1) wrap-around columns per row are dropped later.
    L_out = OH * W - (k - 1)

    # LoRA weight (a few hundred FLOPs): (B @ A).view(out_c, in_c, k, k) *
    # scaling, done in plain jnp, re-laid-out per-tap as (k*k, out_c, in_c).
    w = ((B @ A) * scaling).reshape(out_c, C, k, k)
    wk = jnp.transpose(w, (2, 3, 0, 1)).reshape(k * k, out_c, C)
    wk = wk.astype(jnp.bfloat16)

    xf = x.astype(jnp.bfloat16).reshape(N, C, H * W)   # contiguous -> free

    # TODO(synk): exploit the low-rank (patches·A^T)·B^T factorization inside
    # the kernel for large channel counts; skipped here because the torch
    # .view scrambles (kh, ci, kw) and the test channel counts are tiny.
    ytmp = pl.pallas_call(
        functools.partial(_lora_conv_kernel, k=k, W=W),
        out_shape=jax.ShapeDtypeStruct((N, out_c, L_out), jnp.float32),
        grid=(N,),
        in_specs=[
            pl.BlockSpec((1, C, H * W), lambda n: (n, 0, 0)),
            pl.BlockSpec((k * k, out_c, C), lambda n: (0, 0, 0)),
        ],
        out_specs=pl.BlockSpec((1, out_c, L_out), lambda n: (n, 0, 0)),
        compiler_params=pltpu.CompilerParams(
            dimension_semantics=("parallel",),
            vmem_limit_bytes=32 * 1024 * 1024,
        ),
    )(xf, wk)

    # Un-flatten: pad the (k-1) missing tail positions, reshape to rows of
    # width W, drop the (k-1) wrap-around columns of each row.
    y = jnp.pad(ytmp, ((0, 0), (0, 0), (0, k - 1)))
    return y.reshape(N, out_c, OH, W)[:, :, :, :OW]


class LowRankConvPallas:
    """JAX/Pallas port of LowRankConv (forward only)."""

    def __init__(self, in_channel, out_channel, kernel_size, r, lora_alpha=1,
                 key=None):
        if key is None:
            key = jax.random.PRNGKey(0)
        self.in_c = in_channel
        self.out_c = out_channel
        self.k = kernel_size
        self.r = r
        self.scaling = lora_alpha / r
        kA, kB = jax.random.split(key)
        # kaiming_uniform_(a=sqrt(5)) -> U(-1/sqrt(fan_in), 1/sqrt(fan_in))
        bA = 1.0 / math.sqrt(in_channel * kernel_size)
        bB = 1.0 / math.sqrt(r * kernel_size)
        self.A = jax.random.uniform(
            kA, (r * kernel_size, in_channel * kernel_size),
            minval=-bA, maxval=bA, dtype=jnp.float32)
        self.B = jax.random.uniform(
            kB, (out_channel * kernel_size, r * kernel_size),
            minval=-bB, maxval=bB, dtype=jnp.float32)

    def __call__(self, x):
        return lora_conv2d(x, self.A, self.B,
                           kernel_size=self.k, scaling=self.scaling)


# --------------------------------- main ---------------------------------------

if __name__ == "__main__":
    key = jax.random.PRNGKey(0)
    k_x, k_p = jax.random.split(key)

    N, in_c, H, W = 2, 4, 16, 16
    out_c, ksize, r = 8, 3, 2

    x = jax.random.normal(k_x, (N, in_c, H, W), dtype=jnp.float32)

    mod = LowRankConvPallas(in_c, out_c, ksize, r=r, lora_alpha=1, key=k_p)
    y = jax.block_until_ready(mod(x))
    assert y.shape == (N, out_c, H - ksize + 1, W - ksize + 1)

    # Reference 1: XLA conv with the same bf16-rounded operands (the kernel
    # feeds bf16 to the MXU with f32 accumulation) -> tight tolerance.
    w_full = ((mod.B @ mod.A) * mod.scaling).reshape(out_c, in_c, ksize, ksize)
    xq = x.astype(jnp.bfloat16).astype(jnp.float32)
    wq = w_full.astype(jnp.bfloat16).astype(jnp.float32)
    y_ref = jax.lax.conv_general_dilated(
        xq, wq, window_strides=(1, 1), padding="VALID",
        dimension_numbers=("NCHW", "OIHW", "NCHW"),
        precision=jax.lax.Precision.HIGHEST)
    assert jnp.allclose(y, y_ref, atol=1e-3, rtol=1e-3), \
        float(jnp.max(jnp.abs(y - y_ref)))

    # Reference 2: full-f32 conv -> loose tolerance (bf16 operand rounding).
    y_ref32 = jax.lax.conv_general_dilated(
        x, w_full, window_strides=(1, 1), padding="VALID",
        dimension_numbers=("NCHW", "OIHW", "NCHW"),
        precision=jax.lax.Precision.HIGHEST)
    assert jnp.allclose(y, y_ref32, atol=5e-2, rtol=5e-2), \
        float(jnp.max(jnp.abs(y - y_ref32)))

    print("KERNEL_OK")
</pallas_src>

<mosaic_0001>
module attributes {stable_mosaic.version = 11 : i64} {
  func.func @_lora_conv_kernel(%arg0: i32, %arg1: memref<1x4x256xbf16, #tpu.memory_space<vmem>>, %arg2: memref<9x8x4xbf16, #tpu.memory_space<vmem>>, %arg3: memref<1x8x222xf32, #tpu.memory_space<vmem>>) attributes {dimension_semantics = [#tpu.dimension_semantics<parallel>], iteration_bounds = array<i64: 2>, scalar_prefetch = 0 : i64, scratch_operands = 0 : i64, tpu.core_type = #tpu.core_type<tc>, window_params = [{transform_indices = @transform_0, window_bounds = array<i64: 1, 4, 256>}, {pipeline_mode = #tpu.pipeline_mode<synchronous>, transform_indices = @transform_1, window_bounds = array<i64: 9, 8, 4>}, {transform_indices = @transform_2, window_bounds = array<i64: 1, 8, 222>}]} {
    %cst = arith.constant 0.000000e+00 : f32
    %0 = vector.broadcast %cst : f32 to vector<8x222xf32>
    %c0 = arith.constant 0 : index
    %c0_0 = arith.constant 0 : index
    %c0_1 = arith.constant 0 : index
    %1 = vector.load %arg1[%c0, %c0_0, %c0_1] : memref<1x4x256xbf16, #tpu.memory_space<vmem>>, vector<1x4x222xbf16>
    %2 = vector.shape_cast %1 : vector<1x4x222xbf16> to vector<4x222xbf16>
    %c0_2 = arith.constant 0 : index
    %c0_3 = arith.constant 0 : index
    %c0_4 = arith.constant 0 : index
    %3 = vector.load %arg2[%c0_2, %c0_3, %c0_4] : memref<9x8x4xbf16, #tpu.memory_space<vmem>>, vector<1x8x4xbf16>
    %4 = vector.shape_cast %3 : vector<1x8x4xbf16> to vector<8x4xbf16>
    %cst_5 = arith.constant dense<0.000000e+00> : vector<8x222xf32>
    %5 = tpu.matmul %4, %2, %cst_5 {dimension_numbers = #tpu.dot_dimension_numbers<[1], [0], [0], [1], [0, 0, 1, 1], [], []>} : vector<8x4xbf16>, vector<4x222xbf16>, vector<8x222xf32> -> vector<8x222xf32>
    %6 = arith.addf %0, %5 : vector<8x222xf32>
    %c0_6 = arith.constant 0 : index
    %c0_7 = arith.constant 0 : index
    %c1 = arith.constant 1 : index
    %7 = vector.load %arg1[%c0_6, %c0_7, %c1] : memref<1x4x256xbf16, #tpu.memory_space<vmem>>, vector<1x4x222xbf16>
    %8 = vector.shape_cast %7 : vector<1x4x222xbf16> to vector<4x222xbf16>
    %c1_8 = arith.constant 1 : index
    %c0_9 = arith.constant 0 : index
    %c0_10 = arith.constant 0 : index
    %9 = vector.load %arg2[%c1_8, %c0_9, %c0_10] : memref<9x8x4xbf16, #tpu.memory_space<vmem>>, vector<1x8x4xbf16>
    %10 = vector.shape_cast %9 : vector<1x8x4xbf16> to vector<8x4xbf16>
    %cst_11 = arith.constant dense<0.000000e+00> : vector<8x222xf32>
    %11 = tpu.matmul %10, %8, %cst_11 {dimension_numbers = #tpu.dot_dimension_numbers<[1], [0], [0], [1], [0, 0, 1, 1], [], []>} : vector<8x4xbf16>, vector<4x222xbf16>, vector<8x222xf32> -> vector<8x222xf32>
    %12 = arith.addf %6, %11 : vector<8x222xf32>
    %c0_12 = arith.constant 0 : index
    %c0_13 = arith.constant 0 : index
    %c2 = arith.constant 2 : index
    %13 = vector.load %arg1[%c0_12, %c0_13, %c2] : memref<1x4x256xbf16, #tpu.memory_space<vmem>>, vector<1x4x222xbf16>
    %14 = vector.shape_cast %13 : vector<1x4x222xbf16> to vector<4x222xbf16>
    %c2_14 = arith.constant 2 : index
    %c0_15 = arith.constant 0 : index
    %c0_16 = arith.constant 0 : index
    %15 = vector.load %arg2[%c2_14, %c0_15, %c0_16] : memref<9x8x4xbf16, #tpu.memory_space<vmem>>, vector<1x8x4xbf16>
    %16 = vector.shape_cast %15 : vector<1x8x4xbf16> to vector<8x4xbf16>
    %cst_17 = arith.constant dense<0.000000e+00> : vector<8x222xf32>
    %17 = tpu.matmul %16, %14, %cst_17 {dimension_numbers = #tpu.dot_dimension_numbers<[1], [0], [0], [1], [0, 0, 1, 1], [], []>} : vector<8x4xbf16>, vector<4x222xbf16>, vector<8x222xf32> -> vector<8x222xf32>
    %18 = arith.addf %12, %17 : vector<8x222xf32>
    %c0_18 = arith.constant 0 : index
    %c0_19 = arith.constant 0 : index
    %c16 = arith.constant 16 : index
    %19 = vector.load %arg1[%c0_18, %c0_19, %c16] : memref<1x4x256xbf16, #tpu.memory_space<vmem>>, vector<1x4x222xbf16>
    %20 = vector.shape_cast %19 : vector<1x4x222xbf16> to vector<4x222xbf16>
    %c3 = arith.constant 3 : index
    %c0_20 = arith.constant 0 : index
    %c0_21 = arith.constant 0 : index
    %21 = vector.load %arg2[%c3, %c0_20, %c0_21] : memref<9x8x4xbf16, #tpu.memory_space<vmem>>, vector<1x8x4xbf16>
    %22 = vector.shape_cast %21 : vector<1x8x4xbf16> to vector<8x4xbf16>
    %cst_22 = arith.constant dense<0.000000e+00> : vector<8x222xf32>
    %23 = tpu.matmul %22, %20, %cst_22 {dimension_numbers = #tpu.dot_dimension_numbers<[1], [0], [0], [1], [0, 0, 1, 1], [], []>} : vector<8x4xbf16>, vector<4x222xbf16>, vector<8x222xf32> -> vector<8x222xf32>
    %24 = arith.addf %18, %23 : vector<8x222xf32>
    %c0_23 = arith.constant 0 : index
    %c0_24 = arith.constant 0 : index
    %c17 = arith.constant 17 : index
    %25 = vector.load %arg1[%c0_23, %c0_24, %c17] : memref<1x4x256xbf16, #tpu.memory_space<vmem>>, vector<1x4x222xbf16>
    %26 = vector.shape_cast %25 : vector<1x4x222xbf16> to vector<4x222xbf16>
    %c4 = arith.constant 4 : index
    %c0_25 = arith.constant 0 : index
    %c0_26 = arith.constant 0 : index
    %27 = vector.load %arg2[%c4, %c0_25, %c0_26] : memref<9x8x4xbf16, #tpu.memory_space<vmem>>, vector<1x8x4xbf16>
    %28 = vector.shape_cast %27 : vector<1x8x4xbf16> to vector<8x4xbf16>
    %cst_27 = arith.constant dense<0.000000e+00> : vector<8x222xf32>
    %29 = tpu.matmul %28, %26, %cst_27 {dimension_numbers = #tpu.dot_dimension_numbers<[1], [0], [0], [1], [0, 0, 1, 1], [], []>} : vector<8x4xbf16>, vector<4x222xbf16>, vector<8x222xf32> -> vector<8x222xf32>
    %30 = arith.addf %24, %29 : vector<8x222xf32>
    %c0_28 = arith.constant 0 : index
    %c0_29 = arith.constant 0 : index
    %c18 = arith.constant 18 : index
    %31 = vector.load %arg1[%c0_28, %c0_29, %c18] : memref<1x4x256xbf16, #tpu.memory_space<vmem>>, vector<1x4x222xbf16>
    %32 = vector.shape_cast %31 : vector<1x4x222xbf16> to vector<4x222xbf16>
    %c5 = arith.constant 5 : index
    %c0_30 = arith.constant 0 : index
    %c0_31 = arith.constant 0 : index
    %33 = vector.load %arg2[%c5, %c0_30, %c0_31] : memref<9x8x4xbf16, #tpu.memory_space<vmem>>, vector<1x8x4xbf16>
    %34 = vector.shape_cast %33 : vector<1x8x4xbf16> to vector<8x4xbf16>
    %cst_32 = arith.constant dense<0.000000e+00> : vector<8x222xf32>
    %35 = tpu.matmul %34, %32, %cst_32 {dimension_numbers = #tpu.dot_dimension_numbers<[1], [0], [0], [1], [0, 0, 1, 1], [], []>} : vector<8x4xbf16>, vector<4x222xbf16>, vector<8x222xf32> -> vector<8x222xf32>
    %36 = arith.addf %30, %35 : vector<8x222xf32>
    %c0_33 = arith.constant 0 : index
    %c0_34 = arith.constant 0 : index
    %c32 = arith.constant 32 : index
    %37 = vector.load %arg1[%c0_33, %c0_34, %c32] : memref<1x4x256xbf16, #tpu.memory_space<vmem>>, vector<1x4x222xbf16>
    %38 = vector.shape_cast %37 : vector<1x4x222xbf16> to vector<4x222xbf16>
    %c6 = arith.constant 6 : index
    %c0_35 = arith.constant 0 : index
    %c0_36 = arith.constant 0 : index
    %39 = vector.load %arg2[%c6, %c0_35, %c0_36] : memref<9x8x4xbf16, #tpu.memory_space<vmem>>, vector<1x8x4xbf16>
    %40 = vector.shape_cast %39 : vector<1x8x4xbf16> to vector<8x4xbf16>
    %cst_37 = arith.constant dense<0.000000e+00> : vector<8x222xf32>
    %41 = tpu.matmul %40, %38, %cst_37 {dimension_numbers = #tpu.dot_dimension_numbers<[1], [0], [0], [1], [0, 0, 1, 1], [], []>} : vector<8x4xbf16>, vector<4x222xbf16>, vector<8x222xf32> -> vector<8x222xf32>
    %42 = arith.addf %36, %41 : vector<8x222xf32>
    %c0_38 = arith.constant 0 : index
    %c0_39 = arith.constant 0 : index
    %c33 = arith.constant 33 : index
    %43 = vector.load %arg1[%c0_38, %c0_39, %c33] : memref<1x4x256xbf16, #tpu.memory_space<vmem>>, vector<1x4x222xbf16>
    %44 = vector.shape_cast %43 : vector<1x4x222xbf16> to vector<4x222xbf16>
    %c7 = arith.constant 7 : index
    %c0_40 = arith.constant 0 : index
    %c0_41 = arith.constant 0 : index
    %45 = vector.load %arg2[%c7, %c0_40, %c0_41] : memref<9x8x4xbf16, #tpu.memory_space<vmem>>, vector<1x8x4xbf16>
    %46 = vector.shape_cast %45 : vector<1x8x4xbf16> to vector<8x4xbf16>
    %cst_42 = arith.constant dense<0.000000e+00> : vector<8x222xf32>
    %47 = tpu.matmul %46, %44, %cst_42 {dimension_numbers = #tpu.dot_dimension_numbers<[1], [0], [0], [1], [0, 0, 1, 1], [], []>} : vector<8x4xbf16>, vector<4x222xbf16>, vector<8x222xf32> -> vector<8x222xf32>
    %48 = arith.addf %42, %47 : vector<8x222xf32>
    %c0_43 = arith.constant 0 : index
    %c0_44 = arith.constant 0 : index
    %c34 = arith.constant 34 : index
    %49 = vector.load %arg1[%c0_43, %c0_44, %c34] : memref<1x4x256xbf16, #tpu.memory_space<vmem>>, vector<1x4x222xbf16>
    %50 = vector.shape_cast %49 : vector<1x4x222xbf16> to vector<4x222xbf16>
    %c8 = arith.constant 8 : index
    %c0_45 = arith.constant 0 : index
    %c0_46 = arith.constant 0 : index
    %51 = vector.load %arg2[%c8, %c0_45, %c0_46] : memref<9x8x4xbf16, #tpu.memory_space<vmem>>, vector<1x8x4xbf16>
    %52 = vector.shape_cast %51 : vector<1x8x4xbf16> to vector<8x4xbf16>
    %cst_47 = arith.constant dense<0.000000e+00> : vector<8x222xf32>
    %53 = tpu.matmul %52, %50, %cst_47 {dimension_numbers = #tpu.dot_dimension_numbers<[1], [0], [0], [1], [0, 0, 1, 1], [], []>} : vector<8x4xbf16>, vector<4x222xbf16>, vector<8x222xf32> -> vector<8x222xf32>
    %54 = arith.addf %48, %53 : vector<8x222xf32>
    %c0_48 = arith.constant 0 : index
    %c0_49 = arith.constant 0 : index
    %c0_50 = arith.constant 0 : index
    %55 = vector.load %arg3[%c0_48, %c0_49, %c0_50] : memref<1x8x222xf32, #tpu.memory_space<vmem>>, vector<1x8x222xf32>
    %56 = vector.shape_cast %55 : vector<1x8x222xf32> to vector<8x222xf32>
    %57 = vector.shape_cast %54 : vector<8x222xf32> to vector<1x8x222xf32>
    tpu.vector_store %arg3[%c0_48, %c0_49, %c0_50], %57 {strides = array<i32>} : memref<1x8x222xf32, #tpu.memory_space<vmem>>, vector<1x8x222xf32>,
    return
  }
  func.func @transform_0(%arg0: i32) -> (i32, i32, i32) {
    %c0_i32 = arith.constant 0 : i32
    %c0_i32_0 = arith.constant 0 : i32
    %c0_i32_1 = arith.constant 0 : i32
    return %arg0, %c0_i32, %c0_i32_0 : i32, i32, i32
  }
  func.func @transform_1(%arg0: i32) -> (i32, i32, i32) {
    %c0_i32 = arith.constant 0 : i32
    %c0_i32_0 = arith.constant 0 : i32
    %c0_i32_1 = arith.constant 0 : i32
    %c0_i32_2 = arith.constant 0 : i32
    return %c0_i32, %c0_i32_0, %c0_i32_1 : i32, i32, i32
  }
  func.func @transform_2(%arg0: i32) -> (i32, i32, i32) {
    %c0_i32 = arith.constant 0 : i32
    %c0_i32_0 = arith.constant 0 : i32
    %c0_i32_1 = arith.constant 0 : i32
    return %arg0, %c0_i32, %c0_i32_0 : i32, i32, i32
  }
}

</mosaic_0001>

<bundles_post_ra>
// kernel: tpu_custom_call.1
= control target key start
LH: loop header
LB: loop body
LE: loop exit
PB: predicated region body
PF: predicated region fallthrough
CT: control target
= control target key end

     0   :  { %7 = vsyncpa [#allocation3], 0  ;;  %s1211_s0 = inlined_call_operand.vmem [shape: bf16[2,4,256], index: 0, kind: input, shape index: {}]   ;;  %s1212_s1 = inlined_call_operand.vmem [shape: bf16[9,8,4], index: 1, kind: input, shape index: {}]   ;;  %s1213_s2 = inlined_call_operand.hbm [shape: f32[2,8,222], index: 2, kind: output, shape index: {}]  }
   0x1   :  { %9 = vsyncpa [#allocation3 + $0x1], 0  ;;  %s1046_s9 = smov 0   ;;  %s1048_s10 = smov 0  }
   0x2   :  { %s1050_s11 = smov 0   ;;  %s1052_s12 = smov 0  }
   0x3 LB: > { %s1067_s13 = sadd.s32 4294967295, %s1019_s12   ;;  %s831_s14 = sadd.s32 4294967294, %s1019_s12   ;;  %s1019_s12 = sphi %s1052_s12, %s1219_s12   ;;  %s1015_s11 = sphi %s1050_s11, %s1218_s11   ;;  %s1011_s10 = sphi %s1048_s10, %s1217_s10   ;;  %s1007_s9 = sphi %s1046_s9, %s1216_s9  }
   0x4   : > { %s1071_s15 = sadd.s32 1, %s1019_s12   ;;  %s69_s16 = sadd.s32 1, %s1015_s11 }
   0x5   : > { %s66_s17 = ssub.s32 %s1019_s12, %s1071_s15  ;;  %p79_p0 = scmp.ne.s32.totalorder %s1015_s11, %s1011_s10 }
   0x6   : > { %p67_p1 = scmp.eq.s32.totalorder %s66_s17, 0  ;;  %p80_p2 = scmp.eq.s32.totalorder %s1067_s13, 1 }
   0x7   : > { %p85_p3 = scmp.ne.s32.totalorder %s1011_s10, %s1007_s9  ;;  %p86_p4 = scmp.eq.s32.totalorder %s831_s14, 1 }
   0x8   : > { %s1082_s18 = scalar_select %p67_p1, %s1015_s11, %s69_s16  }
   0x9   : > { %p1084_p5 = por %p80_p2, %p79_p0  ;;  %p1088_p6 = por %p86_p4, %p85_p3 }
   0xa   : > { %p834_p7 = scmp.ge.s32.totalorder %s1019_s12, 1  ;;  %p115_p8 = scmp.lt.s32.totalorder %s1019_s12, 3 }
   0xc   : > { %p116_p9 = pnand %p834_p7, %p115_p8 }
   0xd   : > { %p137_p10 = scmp.lt.s32.totalorder (!%p116_p9), %s1067_s13, 1  ;;  %v1021_v0 = vmov (!%p116_p9), 0   ;;  %s1022_s26 = smov (!%p116_p9), 111   ;;  %vm166_vm0 = vcmask (!%p116_p9), 1041408   ;;  %vm160_vm1 = vcmask (!%p116_p9), 1039360   ;;  %vm420_vm2 = vcmask (!%p116_p9), 908288  }
   0xe   : > { %119 = sbr.rel (%p116_p9) target bundleno = 427 (0x1ab), region = 28  ;;  %205 = vmatprep.mubr.bf16.mxu1 (!%p116_p9), %v1021_v0  ;;  %463 = vmatprep.mubr.bf16.mxu0 (!%p116_p9), %v1021_v0  ;;  %s1023_s27 = smov (!%p116_p9), 127   ;;  %vm490_vm3 = vcmask (!%p116_p9), 900096   ;;  %v838_v11 = vld [vmem:[%s1212_s1 + $0x4] sm:$0xf] (!%p116_p9)  ;;  %vm162_vm4 = vcmask (!%p116_p9), 31744  }
   0xf   : > { %s1024_s28 = smov (!%p116_p9), 110   ;;  %s1025_s29 = smov (!%p116_p9), 96   ;;  %v852_v12 = vld [vmem:[%s1212_s1 + $0x10] sm:$0xf] (!%p116_p9)  ;;  %vm560_vm5 = vcmask (!%p116_p9), 785408   ;;  %vm280_vm6 = vcmask (!%p116_p9), 1031168  }
  0x10   : > { %s1026_s30 = smov (!%p116_p9), 126   ;;  %s1027_s3 = smov (!%p116_p9), 95   ;;  %v144_v24 = vld [vmem:[%s1212_s1] sm:$0xf] (!%p116_p9)  ;;  %v856_v25 = vld [vmem:[%s1212_s1 + $0x14] sm:$0xf] (!%p116_p9) }
  0x11   : > { %s1028_s4 = smov (!%p116_p9), 112   ;;  %s1029_s5 = smov (!%p116_p9), 94   ;;  %vm630_vm7 = vcmask (!%p116_p9), 777216   ;;  %vm350_vm8 = vcmask (!%p116_p9), 916480   ;;  %v844_v34 = vld [vmem:[%s1212_s1 + $0x8] sm:$0xf] (!%p116_p9) }
  0x12   : > { %v860_v35 = vld [vmem:[%s1212_s1 + $0x18] sm:$0xf] (!%p116_p9)  ;;  %vm700_vm9 = vcmask (!%p116_p9), 769024   ;;  %v848_v41 = vld [vmem:[%s1212_s1 + $0xc] sm:$0xf] (!%p116_p9)  ;;  %s878_s7 = sshll.u32 (!%p116_p9), %s1067_s13, 8 }
  0x13   : > { %v864_v42 = vld [vmem:[%s1212_s1 + $0x1c] sm:$0xf] (!%p116_p9)  ;;  %v868_v44 = vld [vmem:[%s1212_s1 + $0x20] sm:$0xf] (!%p116_p9)  ;;  %s1030_s23 = smov (!%p116_p9), [#allocation2]  }
  0x14   : > { %s961_s24 = sshll.u32 (!%p116_p9), %s1030_s23, 4  ;;  %s962_s24 = int_to_ptr.vmem [resolvable:$false] %s961_s24 }
  0x15   : > { %s138_s21 = scalar_select %p137_p10, %s1067_s13, 1 }
  0x17   : > { %s877_s22 = sshll.u32 %s138_s21, 2  ;;  %s1168_s21 = scalar_lea.hbm %s1213_s2, %s878_s7 }
  0x18   : > { %s141_s25 = scalar_lea.vmem %s1211_s0, %s877_s22 }
  0x19   : > { %v853_v1 = vld.sshfl [vmem:[%s141_s25] sm:$0x33 pattern:$0x76325410]  ;;  %s963_s25 = scalar_lea.vmem %s962_s24, 512 }
  0x1a   : > { %416 = vrot.lane.b32.xlu0 %v853_v1, %s1022_s26  ;;  %v415_v2 = vcombine.high %v853_v1, %v853_v1  ;;  %156 = vrot.lane.b32.xlu1 %v853_v1, %s1023_s27  ;;  %v218_v15 = vsel %vm166_vm0, %v853_v1, 0 }
  0x1e   : > { %418 = vrot.lane.b32.xlu0 %v415_v2, %s1022_s26  ;;  %158 = vrot.lane.b32.xlu1 %v415_v2, %s1023_s27 }
  0x22   : > { %486 = vrot.lane.b32.xlu0 %v853_v1, %s1024_s28  ;;  %488 = vrot.lane.b32.xlu1 %v415_v2, %s1024_s28 }
  0x26   : > { %556 = vrot.lane.b32.xlu0 %v853_v1, %s1025_s29  ;;  %558 = vrot.lane.b32.xlu1 %v415_v2, %s1025_s29 }
  0x2a   : > { %276 = vrot.lane.b32.xlu0 %v853_v1, %s1026_s30  ;;  %278 = vrot.lane.b32.xlu1 %v415_v2, %s1026_s30 }
  0x2e   : > { %626 = vrot.lane.b32.xlu0 %v853_v1, %s1027_s3  ;;  %628 = vrot.lane.b32.xlu1 %v415_v2, %s1027_s3 }
  0x32   : > { %346 = vrot.lane.b32.xlu0 %v853_v1, %s1028_s4  ;;  %348 = vrot.lane.b32.xlu1 %v415_v2, %s1028_s4 }
  0x36   : > { %696 = vrot.lane.b32.xlu0 %v853_v1, %s1029_s5  ;;  %698 = vrot.lane.b32.xlu1 %v415_v2, %s1029_s5  ;;  %s134_s5 = sand.u32 1, %s1011_s10  }
  0x37   : > { %s835_s6 = sshll.u32 %s134_s5, 4  ;;  %s758_s13 = scalar_lea.sflag [#allocation3], %s134_s5 }
  0x38   : > { %s136_s8 = scalar_lea.vmem [#allocation2], %s835_s6 }
  0x39   : > { %s772_s14 = sshll.u32 %s136_s8, 4  ;;  %s1170_s14 = int_to_ptr.vmem [resolvable:$true] %s772_s14 }
  0x3a   : > { %s957_s22 = scalar_lea.vmem %s1170_s14, 256  ;;  %p964_p0 = scmp.lt.s32.totalorder %s1170_s14, %s962_s24 }
  0x3b   : > { %p958_p11 = scmp.ne.s32.totalorder %s1170_s14, %s957_s22  ;;  %p965_p1 = scmp.lt.s32.totalorder %s963_s25, %s957_s22 }
  0x3d   : > { %p959_p12 = pnand %p958_p11, %p1084_p5  ;;  %p966_p2 = por %p965_p1, %p964_p0 }
  0x3f   : > { %p960_p13 = pneg %p959_p12 }
  0x41   : > { %p967_p3 = pnand %p966_p2, %p960_p13 }
  0x8c   : > { %v417_v3 = vpop.permute.xlu0 %416  ;;  %v157_v4 = vpop.permute.xlu1 %156 }
  0x90   : > { %v419_v5 = vpop.permute.xlu0 %418  ;;  %v159_v6 = vpop.permute.xlu1 %158 }
  0x91   : > { %840 = vmatprep.subr.msk.bf16.mxu1 %vm166_vm0, %v159_v6  ;;  %854 = vmatprep.subr.msk.bf16.mxu0 %vm166_vm0, %v419_v5  ;;  %v161_v7 = vsel %vm160_vm1, %v157_v4, %v159_v6  ;;  %v421_v8 = vsel %vm420_vm2, %v417_v3, %v419_v5 }
  0x92   : > { %v168_v9 = vsel %vm166_vm0, %v161_v7, 0  ;;  %v426_v10 = vsel %vm166_vm0, %v421_v8, 0 }
  0x93   : > { %174 = vmatpush1.bf16.msra.mxu1 %v168_v9  ;;  %432 = vmatpush1.bf16.msra.mxu0 %v426_v10 }
  0x94   : > { %v487_v13 = vpop.permute.xlu0 %486  ;;  %v489_v14 = vpop.permute.xlu1 %488  ;;  %842 = vmatprep.subr.msk.bf16.mxu1 %vm166_vm0, %v415_v2 }
  0x95   : > { %v491_v16 = vsel %vm490_vm3, %v487_v13, %v489_v14  ;;  %858 = vmatprep.subr.msk.bf16.mxu0 %vm166_vm0, %v489_v14 }
  0x96   : > { %v496_v17 = vsel %vm166_vm0, %v491_v16, 0  ;;  %841 = vmatmul.mubr.msk.bf16.vlgmr.msra.gmra.mrb[0].mxu1 %vm162_vm4, %v838_v11  ;;  %855 = vmatmul.mubr.msk.bf16.vlgmr.msra.gmra.mrb[0].mxu0 %vm162_vm4, %v852_v12 }
  0x97   : > { %502 = vmatpush1.bf16.msra.mxu0 %v496_v17  ;;  %224 = vmatpush1.bf16.msra.mxu1 %v218_v15 }
  0x98   : > { %v557_v18 = vpop.permute.xlu0 %556  ;;  %v559_v19 = vpop.permute.xlu1 %558  ;;  %255 = vmatprep.mubr.bf16.mxu1 %v1021_v0  ;;  %533 = vmatprep.mubr.bf16.mxu0 %v1021_v0 }
  0x99   : > { %862 = vmatprep.subr.msk.bf16.mxu0 %vm166_vm0, %v559_v19  ;;  %v561_v22 = vsel %vm560_vm5, %v557_v18, %v559_v19 }
  0x9a   : > { %v566_v26 = vsel %vm166_vm0, %v561_v22, 0 }
  0x9c   : > { %v277_v20 = vpop.permute.xlu0 %276  ;;  %v279_v21 = vpop.permute.xlu1 %278 }
  0x9d   : > { %v281_v23 = vsel %vm280_vm6, %v277_v20, %v279_v21  ;;  %846 = vmatprep.subr.msk.bf16.mxu1 %vm166_vm0, %v279_v21 }
  0x9e   : > { %v286_v27 = vsel %vm166_vm0, %v281_v23, 0 }
  0xa0   : > { %v627_v28 = vpop.permute.xlu0 %626  ;;  %v629_v29 = vpop.permute.xlu1 %628 }
  0xa1   : > { %v631_v32 = vsel %vm630_vm7, %v627_v28, %v629_v29 }
  0xa2   : > { %843 = vmatmul.mubr.msk.bf16.vlgmr.msra.gmra.mrb[0].mxu1 %vm162_vm4, %v144_v24  ;;  %859 = vmatmul.mubr.msk.bf16.vlgmr.msra.gmra.mrb[0].mxu0 %vm162_vm4, %v856_v25  ;;  %v636_v36 = vsel %vm166_vm0, %v631_v32, 0 }
  0xa3   : > { %572 = vmatpush1.bf16.msra.mxu0 %v566_v26  ;;  %292 = vmatpush1.bf16.msra.mxu1 %v286_v27 }
  0xa4   : > { %323 = vmatprep.mubr.bf16.mxu1 %v1021_v0  ;;  %603 = vmatprep.mubr.bf16.mxu0 %v1021_v0  ;;  %v349_v30 = vpop.permute.xlu1 %348  ;;  %v347_v31 = vpop.permute.xlu0 %346 }
  0xa5   : > { %866 = vmatprep.subr.msk.bf16.mxu0 %vm166_vm0, %v629_v29  ;;  %850 = vmatprep.subr.msk.bf16.mxu1 %vm166_vm0, %v349_v30  ;;  %v351_v33 = vsel %vm350_vm8, %v347_v31, %v349_v30 }
  0xa6   : > { %v356_v37 = vsel %vm166_vm0, %v351_v33, 0 }
  0xa8   : > { %v699_v38 = vpop.permute.xlu1 %698  ;;  %v697_v39 = vpop.permute.xlu0 %696 }
  0xa9   : > { %v701_v40 = vsel %vm700_vm9, %v697_v39, %v699_v38 }
  0xaa   : > { %v706_v43 = vsel %vm166_vm0, %v701_v40, 0 }
  0xae   : > { %847 = vmatmul.mubr.msk.bf16.vlgmr.msra.gmra.mrb[0].mxu1 %vm162_vm4, %v844_v34  ;;  %863 = vmatmul.mubr.msk.bf16.vlgmr.msra.gmra.mrb[0].mxu0 %vm162_vm4, %v860_v35 }
  0xaf   : > { %642 = vmatpush1.bf16.msra.mxu0 %v636_v36  ;;  %362 = vmatpush1.bf16.msra.mxu1 %v356_v37 }
  0xb0   : > { %393 = vmatprep.mubr.bf16.mxu1 %v1021_v0  ;;  %673 = vmatprep.mubr.bf16.mxu0 %v1021_v0 }
  0xb1   : > { %870 = vmatprep.subr.msk.bf16.mxu0 %vm166_vm0, %v699_v38 }
  0xba   : > { %851 = vmatmul.mubr.msk.bf16.vlgmr.msra.gmra.mrb[0].mxu1 %vm162_vm4, %v848_v41  ;;  %867 = vmatmul.mubr.msk.bf16.vlgmr.msra.gmra.mrb[0].mxu0 %vm162_vm4, %v864_v42 }
  0xbb   : > { %712 = vmatpush1.bf16.msra.mxu0 %v706_v43  ;;  %743 = vmatprep.mubr.bf16.mxu0 %v1021_v0 }
  0xc6   : > { %871 = vmatmul.mubr.msk.bf16.vlgmr.msra.gmra.mrb[0].mxu0 %vm162_vm4, %v868_v44 }
 0x18d   : > { %v395_v45 = vpop.f32.mrb[0].mxu1 }
 0x18e   : > { %v397_v46 = vpop.f32.mrb[1].mxu1 }
 0x18f   : > { %v399_v47 = vpop.f32.mrb[2].mxu1 }
 0x190   : > { %v400_v48 = vpop.f32.mrb[3].mxu1 }
 0x199   : > { %v745_v49 = vpop.f32.mrb[0].mxu0 }
 0x19a   : > { %v879_v50 = vadd.f32 %v745_v49, %v395_v45  ;;  %v747_v51 = vpop.f32.mrb[1].mxu0 }
 0x19b   : > { %v880_v52 = vadd.f32 %v747_v51, %v397_v46  ;;  %v749_v53 = vpop.f32.mrb[2].mxu0 }
 0x19c   : > { %754 = vst [vmem:[%s136_s8] sm:$0xff] %v879_v50  ;;  %v750_v54 = vpop.f32.mrb[3].mxu0 }
 0x19d   : > { %756 = vst.msk [vmem:[%s136_s8 + $0x8] sm:$0xff] %vm700_vm9, %v880_v52 }
 0x19e   : > { %970 = shalt.err (!%p967_p3)
}
 0x19f   : > { %s971_s26 = scalar_lea.hbm %s1168_s21, 256  ;;  %s975_s29 = scalar_lea.hbm %s1213_s2, 512 }
 0x1a0   : > { %p972_p4 = scmp.ne.s32.totalorder %s1168_s21, %s971_s26  ;;  %p976_p9 = scmp.lt.u32.totalorder %s1168_s21, %s1213_s2 }
 0x1a1   : > { %p977_p10 = scmp.lt.u32.totalorder %s975_s29, %s971_s26  ;;  %p979_p12 = scmp.lt.u32.totalorder %s971_s26, %s1168_s21 }
 0x1a2   : > { %p973_p7 = pnand %p972_p4, %p1084_p5 }
 0x1a3   : > { %p978_p11 = por %p977_p10, %p976_p9 }
 0x1a4   : > { %p974_p8 = pneg %p973_p7 }
 0x1a5   : > { %p980_p13 = por %p979_p12, %p978_p11 }
 0x1a7   : > { %p981_p0 = pnand %p980_p13, %p974_p8 }
 0x1a9   : > { %984 = shalt.err (!%p981_p0)
}
 0x1aa   : > { %909 = dma.vmem_to_hbm [thread:$0]  (%p1084_p5), %s1170_s14, 256, %s1168_s21, %s758_s13  }
 0x1ab PF: > { %p915_p1 = scmp.ge.s32.totalorder %s1019_s12, 2  ;;  %s784_s4 = sand.u32 1, %s1007_s9  }
 0x1ac   : > { %s785_s5 = scalar_lea.sflag [#allocation3], %s784_s4 }
 0x1ad   : > { %p912_p2 = pnand %p915_p1, %p1088_p6 }
 0x1af   : > { %1002 = dma.done.wait (!%p912_p2), %s785_s5, 256  }
 0x1b0   : > { %1004 = vsyncadd (!%p912_p2), %s785_s5, 4294967040  ;;  %p12_p3 = scmp.ge.s32.totalorder %s1071_s15, 4   ;;  %s1216_s9 = smov %s1011_s10 }
 0x1b1   : > { %s1217_s10 = smov %s1015_s11  ;;  %s1218_s11 = smov %s1082_s18 }
 0x1b2   : > { %s1219_s12 = smov %s1071_s15  ;;  %14 = sbr.rel (!%p12_p3) target bundleno = 3 (0x3), region = 71 }
 0x1b9   :  { %790 = vsyncpa [#allocation3], 1 }
 0x1ba   :  { %792 = vsyncpa [#allocation3 + $0x1], 1 }

</bundles_post_ra>
